<compile_context>
chip_gen: v6e
topology: v6e:2x2x1
jax: 0.10.0
libtpu: 0.0.40
codegen_flags: <defaults>
</compile_context>

<pallas_src>
import functools

import jax
import jax.numpy as jnp
from jax.experimental import pallas as pl
from jax.experimental.pallas import tpu as pltpu


def _round_up(x: int, m: int) -> int:
    return ((x + m - 1) // m) * m


def _cdiv(a: int, b: int) -> int:
    return (a + b - 1) // b


def eegnet_kernel(x_ref, w_ref, b_ref, o_ref):
    # x_ref : (tm, F)     f32   -- streamed batch tile (cast to bf16 in-kernel)
    # w_ref : (F, C_pad)  bf16  -- VMEM-resident transposed weight
    # b_ref : (1, C_pad)  f32   -- VMEM-resident bias (padded classes = -1e30)
    # o_ref : (tm, C_pad) bf16
    logits = jnp.dot(x_ref[...].astype(jnp.bfloat16), w_ref[...],
                     preferred_element_type=jnp.float32) + b_ref[...]
    # Numerically-stable softmax in f32.  Padded classes have logit -1e30, so
    # exp underflows to exactly 0 and they affect neither the max nor the sum.
    m = jnp.max(logits, axis=-1, keepdims=True)
    e = jnp.exp(logits - m)
    denom = jnp.sum(e, axis=-1, keepdims=True)
    # Exact divide (not approx reciprocal) so real-class rows sum to 1 within
    # f32 rounding before the bf16 output cast.
    o_ref[...] = (e / denom).astype(o_ref.dtype)


def prepare_classifier_params(weight, bias):
    """Pad + cast the nn.Linear params once per parameter update, not per call.

    weight: (C, F) as in torch.nn.Linear; bias: (C,).
    Returns (F, C_pad) bf16 transposed weight and (1, C_pad) f32 bias
    (padded classes carry a -1e30 logit so they softmax to 0).
    """
    C, F = weight.shape
    C_pad = _round_up(max(C, 128), 128)
    w_t = jnp.zeros((F, C_pad), jnp.bfloat16).at[:, :C].set(
        weight.T.astype(jnp.bfloat16))
    b_p = jnp.full((1, C_pad), -1e30, jnp.float32).at[0, :C].set(
        bias.astype(jnp.float32))
    return w_t, b_p


@functools.partial(jax.jit, static_argnames=("num_classes", "block_rows"))
def eegnet_forward(x, w_pad, b_pad, *, num_classes, block_rows: int = 1024):
    """EEGnet forward with Identity backbone: softmax(x @ W.T + b).

    x      : (B, F) float32 backbone features
    w_pad  : (F, C_pad) bfloat16  from prepare_classifier_params
    b_pad  : (1, C_pad) float32   from prepare_classifier_params
    returns (B, num_classes) float32 probabilities.
    """
    B, F = x.shape
    C_pad = w_pad.shape[1]

    # Balanced ragged tiling: never round B up to the tile size.  tm is a
    # multiple of 8; the last tile wastes < 8 rows and its out-of-bounds rows
    # are masked on write-back by Pallas.
    n_tiles = _cdiv(B, block_rows)
    tm = _round_up(_cdiv(B, n_tiles), 8)
    grid = (_cdiv(B, tm),)

    cost = pl.CostEstimate(
        flops=2 * grid[0] * tm * F * C_pad,
        transcendentals=grid[0] * tm * C_pad,
        bytes_accessed=B * F * 4 + F * C_pad * 2 + C_pad * 4 + B * C_pad * 2,
    )

    out = pl.pallas_call(
        eegnet_kernel,
        out_shape=jax.ShapeDtypeStruct((B, C_pad), jnp.bfloat16),
        grid_spec=pltpu.PrefetchScalarGridSpec(
            num_scalar_prefetch=0,
            grid=grid,
            in_specs=[
                pl.BlockSpec((tm, F), lambda i: (i, 0)),      # x tiles stream
                pl.BlockSpec((F, C_pad), lambda i: (0, 0)),   # W resident
                pl.BlockSpec((1, C_pad), lambda i: (0, 0)),   # b resident
            ],
            out_specs=pl.BlockSpec((tm, C_pad), lambda i: (i, 0)),
        ),
        compiler_params=pltpu.CompilerParams(
            dimension_semantics=("parallel",)),  # v7x: shard batch over 2 TCs
        cost_estimate=cost,
    )(x, w_pad, b_pad)

    # Only surviving wrapper op: slice the real classes + cast back to f32.
    return out[:, :num_classes].astype(jnp.float32)


def _reference(x, weight, bias):
    """Pure-JAX f32 reference of the same forward."""
    return jax.nn.softmax(x @ weight.T + bias, axis=-1)


def _reference_bf16(x, weight, bias):
    """Reference matching the kernel's bf16-operand / f32-accum matmul."""
    xb = x.astype(jnp.bfloat16).astype(jnp.float32)
    wb = weight.T.astype(jnp.bfloat16).astype(jnp.float32)
    return jax.nn.softmax(xb @ wb + bias, axis=-1)


if __name__ == "__main__":
    # Small shapes consistent with an online-learning EEG classification head:
    # batch=8 trials, 64 backbone features (Identity backbone), 4 classes.
    B, F, C = 8, 64, 4

    key = jax.random.PRNGKey(0)
    kx, kw, kb = jax.random.split(key, 3)

    x = jax.random.normal(kx, (B, F), dtype=jnp.float32)
    # Deterministic nn.Linear-style init (uniform in +/- 1/sqrt(F)).
    bound = 1.0 / jnp.sqrt(jnp.float32(F))
    weight = jax.random.uniform(kw, (C, F), jnp.float32, -bound, bound)
    bias = jax.random.uniform(kb, (C,), jnp.float32, -bound, bound)

    # Param padding/cast hoisted out of the per-call path (done once).
    w_pad, b_pad = prepare_classifier_params(weight, bias)

    out = jax.block_until_ready(eegnet_forward(x, w_pad, b_pad, num_classes=C))
    assert out.shape == (B, C)

    ref_b16 = _reference_bf16(x, weight, bias)
    ref_f32 = _reference(x, weight, bias)
    # bf16 output rounding is ~2^-9 relative; bf16 MXU operands ~1e-2 on logits.
    assert jnp.allclose(out, ref_b16, atol=8e-3, rtol=8e-3)
    assert jnp.allclose(out, ref_f32, atol=5e-2, rtol=5e-2)
    assert jnp.allclose(jnp.sum(out, axis=-1), 1.0, atol=2e-2)

    # Exercise the multi-step ragged-grid path (tm=104, grid=3, only 12 padded
    # rows in the last tile) at a still-small batch.
    B2 = 300
    x2 = jax.random.normal(jax.random.PRNGKey(1), (B2, F), dtype=jnp.float32)
    out2 = jax.block_until_ready(
        eegnet_forward(x2, w_pad, b_pad, num_classes=C, block_rows=128))
    ref2 = _reference_bf16(x2, weight, bias)
    assert out2.shape == (B2, C)
    assert jnp.allclose(out2, ref2, atol=8e-3, rtol=8e-3)
    assert jnp.allclose(jnp.sum(out2, axis=-1), 1.0, atol=2e-2)

    print("KERNEL_OK")
</pallas_src>

<mosaic_0001>
module attributes {stable_mosaic.version = 11 : i64} {
  func.func @eegnet_kernel(%arg0: i32, %arg1: memref<8x64xf32, #tpu.memory_space<vmem>>, %arg2: memref<64x128xbf16, #tpu.memory_space<vmem>>, %arg3: memref<1x128xf32, #tpu.memory_space<vmem>>, %arg4: memref<8x128xbf16, #tpu.memory_space<vmem>>) attributes {dimension_semantics = [#tpu.dimension_semantics<parallel>], iteration_bounds = array<i64: 1>, scalar_prefetch = 0 : i64, scratch_operands = 0 : i64, tpu.core_type = #tpu.core_type<tc>, window_params = [{transform_indices = @transform_0, window_bounds = array<i64: 8, 64>}, {pipeline_mode = #tpu.pipeline_mode<synchronous>, transform_indices = @transform_1, window_bounds = array<i64: 64, 128>}, {pipeline_mode = #tpu.pipeline_mode<synchronous>, transform_indices = @transform_2, window_bounds = array<i64: 1, 128>}, {transform_indices = @transform_3, window_bounds = array<i64: 8, 128>}]} {
    %c0 = arith.constant 0 : index
    %c0_0 = arith.constant 0 : index
    %0 = vector.load %arg1[%c0, %c0_0] : memref<8x64xf32, #tpu.memory_space<vmem>>, vector<8x64xf32>
    %1 = arith.truncf %0 : vector<8x64xf32> to vector<8x64xbf16>
    %c0_1 = arith.constant 0 : index
    %c0_2 = arith.constant 0 : index
    %2 = vector.load %arg2[%c0_1, %c0_2] : memref<64x128xbf16, #tpu.memory_space<vmem>>, vector<64x128xbf16>
    %cst = arith.constant dense<0.000000e+00> : vector<8x128xf32>
    %3 = tpu.matmul %1, %2, %cst {dimension_numbers = #tpu.dot_dimension_numbers<[1], [0], [0], [1], [0, 0, 1, 1], [], []>} : vector<8x64xbf16>, vector<64x128xbf16>, vector<8x128xf32> -> vector<8x128xf32>
    %c0_3 = arith.constant 0 : index
    %c0_4 = arith.constant 0 : index
    %4 = vector.load %arg3[%c0_3, %c0_4] : memref<1x128xf32, #tpu.memory_space<vmem>>, vector<1x128xf32>
    %5 = vector.broadcast %4 : vector<1x128xf32> to vector<8x128xf32>
    %6 = arith.addf %3, %5 : vector<8x128xf32>
    %cst_5 = arith.constant dense<0xFF800000> : vector<8xf32>
    %7 = vector.multi_reduction <maximumf>, %6, %cst_5 [1] : vector<8x128xf32> to vector<8xf32>
    %8 = vector.shape_cast %7 : vector<8xf32> to vector<8x1xf32>
    %9 = vector.broadcast %8 : vector<8x1xf32> to vector<8x128xf32>
    %10 = arith.subf %6, %9 : vector<8x128xf32>
    %11 = math.exp %10 : vector<8x128xf32>
    %cst_6 = arith.constant dense<0.000000e+00> : vector<8xf32>
    %12 = vector.multi_reduction <add>, %11, %cst_6 [1] : vector<8x128xf32> to vector<8xf32>
    %13 = vector.shape_cast %12 : vector<8xf32> to vector<8x1xf32>
    %14 = vector.broadcast %13 : vector<8x1xf32> to vector<8x128xf32>
    %15 = arith.divf %11, %14 : vector<8x128xf32>
    %16 = arith.truncf %15 : vector<8x128xf32> to vector<8x128xbf16>
    %c0_7 = arith.constant 0 : index
    %c0_8 = arith.constant 0 : index
    %17 = vector.load %arg4[%c0_7, %c0_8] : memref<8x128xbf16, #tpu.memory_space<vmem>>, vector<8x128xbf16>
    tpu.vector_store %arg4[%c0_7, %c0_8], %16 {strides = array<i32>} : memref<8x128xbf16, #tpu.memory_space<vmem>>, vector<8x128xbf16>,
    return
  }
  func.func @transform_0(%arg0: i32) -> (i32, i32) {
    %c0_i32 = arith.constant 0 : i32
    %c0_i32_0 = arith.constant 0 : i32
    return %arg0, %c0_i32 : i32, i32
  }
  func.func @transform_1(%arg0: i32) -> (i32, i32) {
    %c0_i32 = arith.constant 0 : i32
    %c0_i32_0 = arith.constant 0 : i32
    %c0_i32_1 = arith.constant 0 : i32
    return %c0_i32, %c0_i32_0 : i32, i32
  }
  func.func @transform_2(%arg0: i32) -> (i32, i32) {
    %c0_i32 = arith.constant 0 : i32
    %c0_i32_0 = arith.constant 0 : i32
    %c0_i32_1 = arith.constant 0 : i32
    return %c0_i32, %c0_i32_0 : i32, i32
  }
  func.func @transform_3(%arg0: i32) -> (i32, i32) {
    %c0_i32 = arith.constant 0 : i32
    %c0_i32_0 = arith.constant 0 : i32
    return %arg0, %c0_i32 : i32, i32
  }
}

</mosaic_0001>

<bundles_post_ra>
// kernel: eegnet_forward.1
= control target key start
LH: loop header
LB: loop body
LE: loop exit
PB: predicated region body
PF: predicated region fallthrough
CT: control target
= control target key end

     0   :  { %8 = vsyncpa [#allocation3], 0  ;;  %s262_s0 = inlined_call_operand.hbm [shape: f32[8,64], index: 0, kind: input, shape index: {}]   ;;  %s263_s1 = inlined_call_operand.hbm [shape: bf16[64,128], index: 1, kind: input, shape index: {}]   ;;  %s264_s2 = inlined_call_operand.vmem [shape: f32[1,128], index: 2, kind: input, shape index: {}]   ;;  %s265_s3 = inlined_call_operand.vmem [shape: bf16[8,128], index: 3, kind: output, shape index: {}]  }
   0x1   :  { %9 = vsyncpa [#allocation5], 0  ;;  %s224_s12 = smov [#allocation2]   ;;  %s225_s14 = smov [#allocation4]  }
   0x2   :  { %s16_s13 = sshll.u32 %s224_s12, 4  ;;  %s25_s15 = sshll.u32 %s225_s14, 4  ;;  %s17_s13 = int_to_ptr.vmem [resolvable:$true] %s16_s13  ;;  %s26_s15 = int_to_ptr.vmem [resolvable:$true] %s25_s15 }
   0x3   :  { %s188_s16 = scalar_lea.vmem %s17_s13, 128  ;;  %p193_p1 = scmp.lt.s32.totalorder %s17_s13, %s17_s13 }
   0x4   :  { %p189_p0 = scmp.ne.s32.totalorder %s17_s13, %s188_s16  ;;  %p194_p2 = scmp.lt.s32.totalorder %s188_s16, %s188_s16 }
   0x6   :  { %p195_p3 = por %p194_p2, %p193_p1 }
   0x8   :  { %p196_p4 = pnand %p195_p3, %p189_p0 }
   0xa   :  { %199 = shalt.err (!%p196_p4)
}
   0xb   :  { %19 = dma.hbm_to_vmem [thread:$0]  %s262_s0, 128, %s17_s13, [#allocation3]  }
   0xc   :  { %s208_s19 = scalar_lea.vmem %s26_s15, 512  ;;  %p213_p6 = scmp.lt.s32.totalorder %s26_s15, %s26_s15 }
   0xd   :  { %p209_p5 = scmp.ne.s32.totalorder %s26_s15, %s208_s19  ;;  %p214_p7 = scmp.lt.s32.totalorder %s208_s19, %s208_s19 }
   0xf   :  { %p215_p8 = por %p214_p7, %p213_p6 }
  0x11   :  { %p216_p9 = pnand %p215_p8, %p209_p5 }
  0x13   :  { %219 = shalt.err (!%p216_p9)
}
  0x14   :  { %s226_s20 = smov 64   ;;  %s227_s21 = smov 4  }
  0x15   :  { %31 = dma.hbm_to_vmem [thread:$0]  %s263_s1, 512, %s26_s15, [#allocation5], %s226_s20, %s226_s20, %s227_s21  }
  0x16   :  { %220 = dma.done.wait [#allocation3], 128  }
  0x17   :  { %221 = vsyncadd [#allocation3], 4294967168 }
  0x18   :  { %222 = dma.done.wait [#allocation5], 512  }
  0x19   :  { %223 = vsyncadd [#allocation5], 4294966784  ;;  %v228_v0 = vmov 0.0   ;;  %vm229_vm0 = vmmov 0   ;;  %v172_v1 = vld [vmem:[#allocation4 + $0x18] sm:$0xff]   ;;  %v173_v2 = vld [vmem:[#allocation4 + $0x10] sm:$0xff]  }
  0x1a   :  { %154 = vmatprep.subr.bf16.mxu0 %v228_v0  ;;  %162 = vmatprep.mubr.msk.bf16.mxu0 %vm229_vm0, %v228_v0  ;;  %v174_v3 = vld [vmem:[#allocation4 + $0x8] sm:$0xff]   ;;  %v175_v4 = vld [vmem:[#allocation4] sm:$0xff]   ;;  %v41_v5 = vld [vmem:[#allocation2] sm:$0xff]  ;;  %vm82_vm1 = vcmask 523264  }
  0x1b   :  { %155 = vmatpush3.bf16.msra.mxu0 %v172_v1  ;;  %v42_v6 = vpack.c.bf16 %v41_v5, %v41_v5  ;;  %v143_v7 = vld [vmem:[%s264_s2] ss:$0 sm:$0xff] }
  0x1c   :  { %156 = vmatprep.subr.bf16.mxu0 %v228_v0 }
  0x1f   :  { %157 = vmatpush3.bf16.msra.mxu0 %v173_v2 }
  0x20   :  { %158 = vmatprep.subr.bf16.mxu0 %v228_v0 }
  0x23   :  { %159 = vmatpush3.bf16.msra.mxu0 %v174_v3 }
  0x24   :  { %160 = vmatprep.subr.bf16.mxu0 %v228_v0 }
  0x27   :  { %161 = vmatpush3.bf16.msra.mxu0 %v175_v4 }
  0x2a   :  { %163 = vmatmul.mubr.msk.bf16.vlgmr.msra.gmra.mxu0 %vm82_vm1, %v42_v6 }
  0xea   :  { %v120_v8 = vpop.f32.mrf.mxu0 }
  0xeb   :  { %v121_v9 = vadd.f32 %v143_v7, %v120_v8 }
  0xec   :  { %v164_v10 = vpop.f32.mrf.mxu0 }
  0xed   :  { %126 = vmax.xlane.f32.xlu0 %v121_v9 }
  0xee   :  { %v123_v11 = vpop.f32.mrf.mxu0 }
  0xf0   :  { %v165_v12 = vpop.f32.mrf.mxu0 }
 0x176   :  { %v127_v13 = vpop.xlane.xlu0 %126 }
 0x177   :  { %v128_v14 = vsub.f32 %v121_v9, %v127_v13 }
 0x179   :  { %v129_v15 = vmul.f32 1.442695, %v128_v14 }
 0x17b   :  { %176 = vpow2.f32 %v129_v15 }
 0x188   :  { %v177_v16 = vpop.eup %176 }
 0x189   :  { %131 = vadd.xlane.f32.xlu0 %v177_v16 }
 0x212   :  { %v132_v17 = vpop.xlane.xlu0 %131 }
 0x213   :  { %178 = vrcp.f32 %v132_v17 }
 0x220   :  { %v179_v18 = vpop.eup %178 }
 0x221   :  { %v134_v19 = vmul.f32 %v179_v18, %v177_v16 }
 0x223   :  { %v135_v20 = vpack.c.bf16 %v134_v19, %v134_v19 }
 0x225   :  { %136 = vst [vmem:[%s265_s3] sm:$0xf] %v135_v20 }
 0x226   :  { %141 = vsyncpa [#allocation3], 1 }
 0x227   :  { %142 = vsyncpa [#allocation5], 1 }

</bundles_post_ra>
